<compile_context>
chip_gen: v7x
topology: tpu7x:2x2x1
jax: 0.10.0
libtpu: 0.0.40
codegen_flags: <defaults>
</compile_context>

<pallas_src>
import functools

import jax
import jax.numpy as jnp
from jax.experimental import pallas as pl
from jax.experimental.pallas import tpu as pltpu


def _round_up(x: int, m: int) -> int:
    return ((x + m - 1) // m) * m


def actor_net_kernel(x_ref, w1_ref, b1_ref, w2_ref, b2_ref, w3_ref, b3_ref, o_ref):
    """Fused 3-layer MLP forward for one batch tile.

    x_ref : (bm, obs_dim)   activations (batch -> sublanes, features -> lanes), f32
    w*_ref: (in, out_p)     pre-transposed, lane-dense weights (f32 or bf16)
    b*_ref: (1, out_p)      f32 biases
    o_ref : (bm, act_p)     lane-dense (padded) f32 output tile
    """
    cdt = w1_ref.dtype  # MXU operand dtype (f32 exact path, or bf16 fast path)

    x = x_ref[...].astype(cdt)
    h1 = jnp.dot(x, w1_ref[...], preferred_element_type=jnp.float32) + b1_ref[...]
    h1 = jnp.maximum(h1, 0.0)

    h2 = jnp.dot(h1.astype(cdt), w2_ref[...], preferred_element_type=jnp.float32) + b2_ref[...]
    h2 = jnp.maximum(h2, 0.0)

    out = jnp.dot(h2.astype(cdt), w3_ref[...], preferred_element_type=jnp.float32) + b3_ref[...]
    o_ref[...] = out.astype(o_ref.dtype)


def prepare_params(params, *, compute_dtype=jnp.float32):
    """One-time pad + transpose of PyTorch nn.Linear params into kernel layout.

    Call once (at init / checkpoint-load time) and cache the result; per-call
    forward work is then limited to padding the batch tail of x.

    params (PyTorch layouts): w1 (hidden, obs), b1 (hidden,), w2 (hidden, hidden),
                              b2 (hidden,), w3 (actions, hidden), b3 (actions,)
    """
    hidden, obs_dim = params["w1"].shape
    num_actions = params["w3"].shape[0]
    hid_p = _round_up(hidden, 128)
    act_p = _round_up(num_actions, 128)
    f32 = jnp.float32
    cdt = compute_dtype

    # Layer-1 K (obs) stays unpadded (MXU pads K internally; padding it only costs
    # x bandwidth). Output feature dims are zero-padded to 128 -> numerically exact.
    w1 = jnp.zeros((obs_dim, hid_p), cdt).at[:, :hidden].set(params["w1"].T.astype(cdt))
    w2 = jnp.zeros((hid_p, hid_p), cdt).at[:hidden, :hidden].set(params["w2"].T.astype(cdt))
    w3 = jnp.zeros((hid_p, act_p), cdt).at[:hidden, :num_actions].set(params["w3"].T.astype(cdt))
    b1 = jnp.zeros((1, hid_p), f32).at[0, :hidden].set(params["b1"].astype(f32))
    b2 = jnp.zeros((1, hid_p), f32).at[0, :hidden].set(params["b2"].astype(f32))
    b3 = jnp.zeros((1, act_p), f32).at[0, :num_actions].set(params["b3"].astype(f32))

    return {
        "w1": w1, "b1": b1, "w2": w2, "b2": b2, "w3": w3, "b3": b3,
        # static metadata (Python ints)
        "obs_dim": obs_dim, "hidden": hidden, "num_actions": num_actions,
        "hid_p": hid_p, "act_p": act_p,
    }


def _choose_bm(batch: int, max_bm: int) -> int:
    """Adaptive batch tile: minimize batch-pad waste, and force >=2 grid steps
    whenever each tile still holds >=8 real rows so v7x can shard the 'parallel'
    batch axis across its 2 TensorCores (harmless on single-TC v5e/v6e)."""
    n_tiles = max(-(-batch // max_bm), 1)
    if batch >= 16:
        n_tiles = max(n_tiles, 2)
    return _round_up(-(-batch // n_tiles), 8)


@functools.lru_cache(maxsize=1)
def _vmem_budget_bytes() -> int:
    """Generation-aware VMEM cap: ~75% of this chip's per-core VMEM
    (v5e/v6e: 128 MiB, v7x: 64 MiB), with a conservative fallback."""
    try:
        cap = int(pltpu.get_tpu_info().vmem_capacity_bytes)
    except Exception:
        cap = 64 << 20
    return (cap * 3) // 4


def actor_net_forward(x, prep, *, max_bm=1024):
    """ActorNet forward: ReLU(x@W1+b1) -> ReLU(@W2+b2) -> @W3+b3.

    x    : (batch, obs_dim) float array
    prep : output of prepare_params() (cached across calls)
    """
    batch, obs_dim = x.shape
    assert obs_dim == prep["obs_dim"], "x feature dim does not match prepared params"
    hid_p, act_p = prep["hid_p"], prep["act_p"]
    num_actions = prep["num_actions"]
    f32 = jnp.float32
    cdt_bytes = jnp.dtype(prep["w1"].dtype).itemsize

    bm = _choose_bm(batch, max_bm)
    batch_p = _round_up(batch, bm)
    grid = (batch_p // bm,)

    x = x.astype(f32)
    if batch_p != batch:
        # Only the batch tail needs padding now (obs dim is unpadded); exact.
        x = jnp.pad(x, ((0, batch_p - batch), (0, 0)))

    # Grid-invariant blocks (weights/biases) only need a single pipeline buffer.
    single = pl.Buffered(1)
    w_spec = lambda r, c: pl.BlockSpec((r, c), lambda i: (0, 0), pipeline_mode=single)

    # VMEM: resident weights/biases (single-buffered) + double-buffered x/out tiles
    # + in-kernel activation temporaries + fixed headroom, capped generation-aware.
    weight_bytes = cdt_bytes * (obs_dim * hid_p + hid_p * hid_p + hid_p * act_p) \
        + 4 * (2 * hid_p + act_p)
    io_bytes = 4 * 2 * (bm * obs_dim + bm * act_p)
    act_bytes = 4 * 3 * bm * hid_p
    vmem_limit = int(min(max(weight_bytes + io_bytes + act_bytes + (4 << 20), 4 << 20),
                         _vmem_budget_bytes()))

    flops = 2 * batch_p * (obs_dim * hid_p + hid_p * hid_p + hid_p * act_p)
    bytes_accessed = 4 * batch_p * (obs_dim + act_p) + weight_bytes

    out_padded = pl.pallas_call(
        actor_net_kernel,
        out_shape=jax.ShapeDtypeStruct((batch_p, act_p), f32),
        grid_spec=pltpu.PrefetchScalarGridSpec(
            num_scalar_prefetch=0,
            grid=grid,
            in_specs=[
                pl.BlockSpec((bm, obs_dim), lambda i: (i, 0)),  # x tile (double-buffered)
                w_spec(obs_dim, hid_p),                         # w1 (resident)
                w_spec(1, hid_p),                               # b1
                w_spec(hid_p, hid_p),                           # w2
                w_spec(1, hid_p),                               # b2
                w_spec(hid_p, act_p),                           # w3
                w_spec(1, act_p),                               # b3
            ],
            out_specs=pl.BlockSpec((bm, act_p), lambda i: (i, 0)),
        ),
        compiler_params=pltpu.CompilerParams(
            dimension_semantics=("parallel",),
            vmem_limit_bytes=vmem_limit,
        ),
        cost_estimate=pl.CostEstimate(
            flops=int(flops), transcendentals=0, bytes_accessed=int(bytes_accessed)
        ),
    )(x, prep["w1"], prep["b1"], prep["w2"], prep["b2"], prep["w3"], prep["b3"])

    # Slice off batch / lane padding (exact).
    return out_padded[:batch, :num_actions]


def init_params(key, obs_dim, hidden, num_actions):
    """Deterministic synthetic initialization (PyTorch nn.Linear shapes)."""
    k1, k2, k3, k4, k5, k6 = jax.random.split(key, 6)
    s1 = 1.0 / jnp.sqrt(obs_dim)
    s2 = 1.0 / jnp.sqrt(hidden)
    return {
        "w1": jax.random.uniform(k1, (hidden, obs_dim), jnp.float32, -s1, s1),
        "b1": jax.random.uniform(k2, (hidden,), jnp.float32, -s1, s1),
        "w2": jax.random.uniform(k3, (hidden, hidden), jnp.float32, -s2, s2),
        "b2": jax.random.uniform(k4, (hidden,), jnp.float32, -s2, s2),
        "w3": jax.random.uniform(k5, (num_actions, hidden), jnp.float32, -s2, s2),
        "b3": jax.random.uniform(k6, (num_actions,), jnp.float32, -s2, s2),
    }


def actor_net_ref(x, params):
    """Pure-JAX reference (mirrors the PyTorch forward)."""
    h1 = jnp.maximum(x @ params["w1"].T + params["b1"], 0.0)
    h2 = jnp.maximum(h1 @ params["w2"].T + params["b2"], 0.0)
    return h2 @ params["w3"].T + params["b3"]


if __name__ == "__main__":
    # Small shapes consistent with ActorNet(observation_shape=(32,), num_actions=8)
    # with the module's default hidden=128.
    batch, obs_dim, hidden, num_actions = 16, 32, 128, 8

    key = jax.random.PRNGKey(0)
    kx, kp = jax.random.split(key)
    x = jax.random.normal(kx, (batch, obs_dim), jnp.float32)
    params = init_params(kp, obs_dim, hidden, num_actions)
    ref = actor_net_ref(x, params)

    # f32 exact path (default): bit-parity class tolerance vs the reference.
    prep_f32 = prepare_params(params, compute_dtype=jnp.float32)
    out = jax.block_until_ready(actor_net_forward(x, prep_f32))
    assert out.shape == (batch, num_actions)
    assert jnp.allclose(out, ref, atol=1e-5, rtol=1e-5), "f32 mismatch vs reference"

    # bf16-operand path (f32 accumulation): MXU-peak configuration on v5e/v6e/v7x.
    prep_bf16 = prepare_params(params, compute_dtype=jnp.bfloat16)
    out_bf16 = jax.block_until_ready(actor_net_forward(x, prep_bf16))
    assert out_bf16.shape == (batch, num_actions)
    assert jnp.allclose(out_bf16, ref, atol=5e-2, rtol=5e-2), "bf16 path outside tolerance"

    print("KERNEL_OK")
</pallas_src>

<mosaic_0001>
module attributes {stable_mosaic.version = 11 : i64} {
  func.func @actor_net_kernel(%arg0: i32, %arg1: memref<8x32xf32, #tpu.memory_space<vmem>>, %arg2: memref<32x128xf32, #tpu.memory_space<vmem>>, %arg3: memref<1x128xf32, #tpu.memory_space<vmem>>, %arg4: memref<128x128xf32, #tpu.memory_space<vmem>>, %arg5: memref<1x128xf32, #tpu.memory_space<vmem>>, %arg6: memref<128x128xf32, #tpu.memory_space<vmem>>, %arg7: memref<1x128xf32, #tpu.memory_space<vmem>>, %arg8: memref<8x128xf32, #tpu.memory_space<vmem>>) attributes {dimension_semantics = [#tpu.dimension_semantics<parallel>], iteration_bounds = array<i64: 2>, scalar_prefetch = 0 : i64, scratch_operands = 0 : i64, tpu.core_type = #tpu.core_type<tc>, window_params = [{transform_indices = @transform_0, window_bounds = array<i64: 8, 32>}, {pipeline_mode = #tpu.pipeline_mode<synchronous>, transform_indices = @transform_1, window_bounds = array<i64: 32, 128>}, {pipeline_mode = #tpu.pipeline_mode<synchronous>, transform_indices = @transform_2, window_bounds = array<i64: 1, 128>}, {pipeline_mode = #tpu.pipeline_mode<synchronous>, transform_indices = @transform_3, window_bounds = array<i64: 128, 128>}, {pipeline_mode = #tpu.pipeline_mode<synchronous>, transform_indices = @transform_4, window_bounds = array<i64: 1, 128>}, {pipeline_mode = #tpu.pipeline_mode<synchronous>, transform_indices = @transform_5, window_bounds = array<i64: 128, 128>}, {pipeline_mode = #tpu.pipeline_mode<synchronous>, transform_indices = @transform_6, window_bounds = array<i64: 1, 128>}, {transform_indices = @transform_7, window_bounds = array<i64: 8, 128>}]} {
    %c0 = arith.constant 0 : index
    %c0_0 = arith.constant 0 : index
    %0 = vector.load %arg1[%c0, %c0_0] : memref<8x32xf32, #tpu.memory_space<vmem>>, vector<8x32xf32>
    %c0_1 = arith.constant 0 : index
    %c0_2 = arith.constant 0 : index
    %1 = vector.load %arg2[%c0_1, %c0_2] : memref<32x128xf32, #tpu.memory_space<vmem>>, vector<32x128xf32>
    %cst = arith.constant dense<0.000000e+00> : vector<8x128xf32>
    %2 = tpu.matmul %0, %1, %cst {dimension_numbers = #tpu.dot_dimension_numbers<[1], [0], [0], [1], [0, 0, 1, 1], [], []>} : vector<8x32xf32>, vector<32x128xf32>, vector<8x128xf32> -> vector<8x128xf32>
    %c0_3 = arith.constant 0 : index
    %c0_4 = arith.constant 0 : index
    %3 = vector.load %arg3[%c0_3, %c0_4] : memref<1x128xf32, #tpu.memory_space<vmem>>, vector<1x128xf32>
    %4 = vector.broadcast %3 : vector<1x128xf32> to vector<8x128xf32>
    %5 = arith.addf %2, %4 : vector<8x128xf32>
    %cst_5 = arith.constant 0.000000e+00 : f32
    %6 = vector.broadcast %cst_5 : f32 to vector<8x128xf32>
    %7 = arith.maximumf %5, %6 : vector<8x128xf32>
    %c0_6 = arith.constant 0 : index
    %c0_7 = arith.constant 0 : index
    %8 = vector.load %arg4[%c0_6, %c0_7] : memref<128x128xf32, #tpu.memory_space<vmem>>, vector<128x128xf32>
    %cst_8 = arith.constant dense<0.000000e+00> : vector<8x128xf32>
    %9 = tpu.matmul %7, %8, %cst_8 {dimension_numbers = #tpu.dot_dimension_numbers<[1], [0], [0], [1], [0, 0, 1, 1], [], []>} : vector<8x128xf32>, vector<128x128xf32>, vector<8x128xf32> -> vector<8x128xf32>
    %c0_9 = arith.constant 0 : index
    %c0_10 = arith.constant 0 : index
    %10 = vector.load %arg5[%c0_9, %c0_10] : memref<1x128xf32, #tpu.memory_space<vmem>>, vector<1x128xf32>
    %11 = vector.broadcast %10 : vector<1x128xf32> to vector<8x128xf32>
    %12 = arith.addf %9, %11 : vector<8x128xf32>
    %cst_11 = arith.constant 0.000000e+00 : f32
    %13 = vector.broadcast %cst_11 : f32 to vector<8x128xf32>
    %14 = arith.maximumf %12, %13 : vector<8x128xf32>
    %c0_12 = arith.constant 0 : index
    %c0_13 = arith.constant 0 : index
    %15 = vector.load %arg6[%c0_12, %c0_13] : memref<128x128xf32, #tpu.memory_space<vmem>>, vector<128x128xf32>
    %cst_14 = arith.constant dense<0.000000e+00> : vector<8x128xf32>
    %16 = tpu.matmul %14, %15, %cst_14 {dimension_numbers = #tpu.dot_dimension_numbers<[1], [0], [0], [1], [0, 0, 1, 1], [], []>} : vector<8x128xf32>, vector<128x128xf32>, vector<8x128xf32> -> vector<8x128xf32>
    %c0_15 = arith.constant 0 : index
    %c0_16 = arith.constant 0 : index
    %17 = vector.load %arg7[%c0_15, %c0_16] : memref<1x128xf32, #tpu.memory_space<vmem>>, vector<1x128xf32>
    %18 = vector.broadcast %17 : vector<1x128xf32> to vector<8x128xf32>
    %19 = arith.addf %16, %18 : vector<8x128xf32>
    %c0_17 = arith.constant 0 : index
    %c0_18 = arith.constant 0 : index
    %20 = vector.load %arg8[%c0_17, %c0_18] : memref<8x128xf32, #tpu.memory_space<vmem>>, vector<8x128xf32>
    tpu.vector_store %arg8[%c0_17, %c0_18], %19 {strides = array<i32>} : memref<8x128xf32, #tpu.memory_space<vmem>>, vector<8x128xf32>,
    return
  }
  func.func @transform_0(%arg0: i32) -> (i32, i32) {
    %c0_i32 = arith.constant 0 : i32
    %c0_i32_0 = arith.constant 0 : i32
    return %arg0, %c0_i32 : i32, i32
  }
  func.func @transform_1(%arg0: i32) -> (i32, i32) {
    %c0_i32 = arith.constant 0 : i32
    %c0_i32_0 = arith.constant 0 : i32
    %c0_i32_1 = arith.constant 0 : i32
    return %c0_i32, %c0_i32_0 : i32, i32
  }
  func.func @transform_2(%arg0: i32) -> (i32, i32) {
    %c0_i32 = arith.constant 0 : i32
    %c0_i32_0 = arith.constant 0 : i32
    %c0_i32_1 = arith.constant 0 : i32
    return %c0_i32, %c0_i32_0 : i32, i32
  }
  func.func @transform_3(%arg0: i32) -> (i32, i32) {
    %c0_i32 = arith.constant 0 : i32
    %c0_i32_0 = arith.constant 0 : i32
    %c0_i32_1 = arith.constant 0 : i32
    return %c0_i32, %c0_i32_0 : i32, i32
  }
  func.func @transform_4(%arg0: i32) -> (i32, i32) {
    %c0_i32 = arith.constant 0 : i32
    %c0_i32_0 = arith.constant 0 : i32
    %c0_i32_1 = arith.constant 0 : i32
    return %c0_i32, %c0_i32_0 : i32, i32
  }
  func.func @transform_5(%arg0: i32) -> (i32, i32) {
    %c0_i32 = arith.constant 0 : i32
    %c0_i32_0 = arith.constant 0 : i32
    %c0_i32_1 = arith.constant 0 : i32
    return %c0_i32, %c0_i32_0 : i32, i32
  }
  func.func @transform_6(%arg0: i32) -> (i32, i32) {
    %c0_i32 = arith.constant 0 : i32
    %c0_i32_0 = arith.constant 0 : i32
    %c0_i32_1 = arith.constant 0 : i32
    return %c0_i32, %c0_i32_0 : i32, i32
  }
  func.func @transform_7(%arg0: i32) -> (i32, i32) {
    %c0_i32 = arith.constant 0 : i32
    %c0_i32_0 = arith.constant 0 : i32
    return %arg0, %c0_i32 : i32, i32
  }
}

</mosaic_0001>

<bundles_post_ra>
// kernel: tpu_custom_call.1
= control target key start
LH: loop header
LB: loop body
LE: loop exit
PB: predicated region body
PF: predicated region fallthrough
CT: control target
= control target key end

     0   :  { %12 = vsyncpa [#allocation3], 0  ;;  %s1544_s0 = inlined_call_operand.hbm [shape: f32[16,32], index: 0, kind: input, shape index: {}]   ;;  %s1545_s1 = inlined_call_operand.hbm [shape: f32[32,128], index: 1, kind: input, shape index: {}]   ;;  %s1546_s2 = inlined_call_operand.vmem [shape: f32[1,128], index: 2, kind: input, shape index: {}]   ;;  %s1547_s3 = inlined_call_operand.hbm [shape: f32[128,128], index: 3, kind: input, shape index: {}]   ;;  %s1548_s4 = inlined_call_operand.vmem [shape: f32[1,128], index: 4, kind: input, shape index: {}]   ;;  %s1549_s5 = inlined_call_operand.hbm [shape: f32[128,128], index: 5, kind: input, shape index: {}]   ;;  %s1550_s6 = inlined_call_operand.vmem [shape: f32[1,128], index: 6, kind: input, shape index: {}]   ;;  %s1551_s7 = inlined_call_operand.hbm [shape: f32[16,128], index: 7, kind: output, shape index: {}]  }
   0x1   :  { %14 = vsyncpa [#allocation3 + $0x1], 0 }
   0x2   :  { %15 = vsyncpa [#allocation6], 0 }
   0x3   :  { %16 = vsyncpa [#allocation9], 0 }
   0x4   :  { %17 = vsyncpa [#allocation4], 0 }
   0x5   :  { %19 = vsyncpa [#allocation4 + $0x1], 0  ;;  %s1244_s24 = smov 0   ;;  %s1246_s25 = smov 0  }
   0x6   :  { %s1248_s26 = smov 0   ;;  %s1250_s27 = smov 0  }
   0x7 LB: > { %s1265_s28 = sadd.s32 4294967295, %s1192_s27   ;;  %s726_s29 = sadd.s32 4294967294, %s1192_s27   ;;  %s1192_s27 = sphi %s1250_s27, %s1577_s27   ;;  %s1188_s26 = sphi %s1248_s26, %s1576_s26   ;;  %s1184_s25 = sphi %s1246_s25, %s1575_s25   ;;  %s1180_s24 = sphi %s1244_s24, %s1574_s24  }
   0x8   : > { %p45_p0 = scmp.ne.s32.totalorder %s1184_s25, %s1180_s24  ;;  %p1552_p1 = scmp.eq.s32.totalorder %s1265_s28, 0 }
   0x9   : > { %p201_p3 = scmp.eq.s32.totalorder %s726_s29, 1  ;;  %p727_p5 = scmp.ge.s32.totalorder %s1192_s27, 1 }
   0xa   : > { %p1274_p4 = por %p1552_p1, %p45_p0  ;;  %p208_p7 = scmp.lt.s32.totalorder %s1192_s27, 3 }
   0xb   : > { %p1279_p6 = por %p201_p3, %p45_p0  ;;  %s1194_s10 = smov [#allocation5]  }
   0xc   : > { %s1556_s30 = scalar_select %p1274_p4, 1, 0 }
   0xd   : > { %s1557_s8 = scalar_select %p1279_p6, 1, 0 }
   0xe   : > { %p1284_p8 = pnand %p727_p5, %p208_p7  ;;  %s220_s11 = sshll.u32 %s1194_s10, 4  ;;  %s1288_s11 = int_to_ptr.vmem [resolvable:$true] %s220_s11 }
   0xf   : > { %1558 = sst [smem:[#allocation15_spill]] %s1557_s8  ;;  %s1195_s13 = smov [#allocation7]  }
  0x10   : > { %s1559_s9 = scalar_select %p1284_p8, 1, 0 }
  0x11   : > { %p938_p9 = pneg %p1284_p8  ;;  %s236_s14 = sshll.u32 %s1195_s13, 4  ;;  %s1299_s14 = int_to_ptr.vmem [resolvable:$true] %s236_s14 }
  0x12   : > { %s1196_s15 = smov [#allocation8]   ;;  %s1004_s19 = scalar_lea.hbm %s1545_s1, 512 }
  0x13   : > { %p1295_p11 = pnand %p938_p9, %p1552_p1  ;;  %s1301_s16 = sshll.u32 %s1196_s15, 4  ;;  %s253_s16 = int_to_ptr.vmem [resolvable:$true] %s1301_s16 }
  0x14   : > { %p1005_p12 = scmp.ne.s32.totalorder %s1545_s1, %s1004_s19  ;;  %p1011_p5 = scmp.lt.u32.totalorder %s1004_s19, %s1545_s1 }
  0x15   : > { %p1311_p13 = pneg %p1295_p11 }
  0x17   : > { %p1007_p0 = pnand %p1311_p13, %p1005_p12 }
  0x19   : > { %p1008_p3 = pneg %p1007_p0 }
  0x1b   : > { %p1013_p7 = pnand %p1011_p5, %p1008_p3 }
  0x1d   : > { %1016 = shalt.err (!%p1013_p7)
}
  0x1e   : > { %s1017_s10 = scalar_lea.vmem %s1288_s11, 512  ;;  %p1025_p2 = scmp.lt.s32.totalorder %s1288_s11, %s1288_s11 }
  0x1f   : > { %p1018_p9 = scmp.ne.s32.totalorder %s1288_s11, %s1017_s10  ;;  %p1026_p6 = scmp.lt.s32.totalorder %s1017_s10, %s1017_s10 }
  0x21   : > { %p1020_p10 = pnand %p1018_p9, %p1311_p13  ;;  %p1027_p12 = por %p1026_p6, %p1025_p2 }
  0x23   : > { %p1021_p1 = pneg %p1020_p10 }
  0x25   : > { %p1028_p0 = pnand %p1027_p12, %p1021_p1 }
  0x27   : > { %1031 = shalt.err (!%p1028_p0)
}
  0x28   : > { %s1197_s13 = smov 128   ;;  %s1198_s15 = smov 8  }
  0x29   : > { %941 = dma.hbm_to_vmem [thread:$0]  (!%p1295_p11), %s1545_s1, 512, %s1288_s11, [#allocation6], %s1197_s13, %s1197_s13, %s1198_s15  }
  0x2a   : > { %s1032_s21 = scalar_lea.hbm %s1547_s3, 2048 }
  0x2b   : > { %p1033_p1 = scmp.ne.s32.totalorder %s1547_s3, %s1032_s21  ;;  %p1039_p10 = scmp.lt.u32.totalorder %s1032_s21, %s1547_s3 }
  0x2d   : > { %p1035_p2 = pnand %p1033_p1, %p1311_p13 }
  0x2f   : > { %p1036_p6 = pneg %p1035_p2 }
  0x31   : > { %p1041_p3 = pnand %p1039_p10, %p1036_p6 }
  0x33   : > { %1044 = shalt.err (!%p1041_p3)
}
  0x34   : > { %s1045_s11 = scalar_lea.vmem %s1299_s14, 2048  ;;  %p1053_p12 = scmp.lt.s32.totalorder %s1299_s14, %s1299_s14 }
  0x35   : > { %p1046_p5 = scmp.ne.s32.totalorder %s1299_s14, %s1045_s11  ;;  %p1054_p0 = scmp.lt.s32.totalorder %s1045_s11, %s1045_s11 }
  0x37   : > { %p1048_p7 = pnand %p1046_p5, %p1311_p13  ;;  %p1055_p1 = por %p1054_p0, %p1053_p12 }
  0x39   : > { %p1049_p9 = pneg %p1048_p7 }
  0x3b   : > { %p1056_p2 = pnand %p1055_p1, %p1049_p9 }
  0x3d   : > { %1059 = shalt.err (!%p1056_p2)
}
  0x3e   : > { %944 = dma.hbm_to_vmem [thread:$0]  (!%p1295_p11), %s1547_s3, 2048, %s1299_s14, [#allocation6], %s1197_s13, %s1197_s13, %s1198_s15  }
  0x3f   : > { %s1060_s20 = scalar_lea.hbm %s1549_s5, 2048 }
  0x40   : > { %p1061_p6 = scmp.ne.s32.totalorder %s1549_s5, %s1060_s20  ;;  %p1067_p5 = scmp.lt.u32.totalorder %s1060_s20, %s1549_s5 }
  0x42   : > { %p1063_p10 = pnand %p1061_p6, %p1311_p13 }
  0x44   : > { %p1064_p3 = pneg %p1063_p10 }
  0x46   : > { %p1069_p7 = pnand %p1067_p5, %p1064_p3 }
  0x48   : > { %1072 = shalt.err (!%p1069_p7)
}
  0x49   : > { %s1073_s11 = scalar_lea.vmem %s253_s16, 2048  ;;  %p1081_p1 = scmp.lt.s32.totalorder %s253_s16, %s253_s16 }
  0x4a   : > { %p1074_p9 = scmp.ne.s32.totalorder %s253_s16, %s1073_s11  ;;  %p1082_p2 = scmp.lt.s32.totalorder %s1073_s11, %s1073_s11 }
  0x4c   : > { %p1076_p12 = pnand %p1074_p9, %p1311_p13  ;;  %p1083_p4 = por %p1082_p2, %p1081_p1 }
  0x4e   : > { %p1077_p0 = pneg %p1076_p12 }
  0x50   : > { %p1084_p8 = pnand %p1083_p4, %p1077_p0 }
  0x52   : > { %1087 = shalt.err (!%p1084_p8)
}
  0x53   : > { %947 = dma.hbm_to_vmem [thread:$0]  (!%p1295_p11), %s1549_s5, 2048, %s253_s16, [#allocation9], %s1197_s13, %s1197_s13, %s1198_s15  }
  0x54   : > { %s1384_s22 = sadd.s32 1, %s1192_s27   ;;  %s32_s17 = sadd.s32 1, %s1188_s26 }
  0x55   : > { %s29_s12 = ssub.s32 %s1192_s27, %s1384_s22  ;;  %p39_p8 = scmp.ne.s32.totalorder %s1188_s26, %s1184_s25 }
  0x56   : > { %p30_p4 = scmp.eq.s32.totalorder %s29_s12, 0  ;;  %p40_p13 = scmp.eq.s32.totalorder %s1192_s27, 0 }
  0x57   : > { %p959_p6 = scmp.lt.s32.totalorder %s1192_s27, 2  ;;  %p1562_p3 = scmp.eq.s32.totalorder %s1265_s28, 1 }
  0x58   : > { %s1394_s18 = scalar_select %p30_p4, %s1188_s26, %s32_s17  }
  0x59   : > { %p41_p10 = por %p40_p13, %p39_p8  ;;  %p1398_p5 = por %p1562_p3, %p39_p8 }
  0x5a   : > { %s269_s20 = sand.u32 1, %s1188_s26   ;;  %s733_s21 = sshll.u32 %s1192_s27, 7 }
  0x5b   : > { %s732_s16 = sshll.u32 %s269_s20, 3  ;;  %s1407_s23 = scalar_lea.hbm %s1544_s0, %s733_s21 }
  0x5c   : > { %s273_s29 = scalar_lea.vmem [#allocation2], %s732_s16  ;;  %p1409_p11 = pnand %p959_p6, %p41_p10 }
  0x5d   : > { %s280_s10 = sshll.u32 %s273_s29, 4  ;;  %s270_s14 = scalar_lea.sflag [#allocation3], %s269_s20  ;;  %s1413_s10 = int_to_ptr.vmem [resolvable:$true] %s280_s10 }
  0x5e   : > { %s1088_s8 = scalar_lea.hbm %s1407_s23, 128  ;;  %p1090_p9 = pneg %p1409_p11 }
  0x5f   : > { %p1089_p7 = scmp.ne.s32.totalorder %s1407_s23, %s1088_s8  ;;  %s1093_s21 = scalar_lea.hbm %s1544_s0, 256 }
  0x60   : > { %p1094_p1 = scmp.lt.u32.totalorder %s1407_s23, %s1544_s0  ;;  %p1095_p2 = scmp.lt.u32.totalorder %s1093_s21, %s1088_s8 }
  0x61   : > { %p1091_p12 = pnand %p1090_p9, %p1089_p7  ;;  %p1097_p8 = scmp.lt.u32.totalorder %s1088_s8, %s1407_s23 }
  0x62   : > { %p1096_p4 = por %p1095_p2, %p1094_p1 }
  0x63   : > { %p1092_p0 = pneg %p1091_p12 }
  0x64   : > { %p1098_p13 = por %p1097_p8, %p1096_p4 }
  0x66   : > { %p1099_p6 = pnand %p1098_p13, %p1092_p0 }
  0x68   : > { %1102 = shalt.err (!%p1099_p6)
}
  0x69   : > { %s1103_s20 = scalar_lea.vmem %s1413_s10, 128  ;;  %s1199_s15 = smov [#allocation2]  }
  0x6a   : > { %p1104_p10 = scmp.ne.s32.totalorder %s1413_s10, %s1103_s20  ;;  %s1108_s29 = sshll.u32 %s1199_s15, 4  ;;  %s1109_s29 = int_to_ptr.vmem [resolvable:$false] %s1108_s29 }
  0x6b   : > { %s1110_s12 = scalar_lea.vmem %s1109_s29, 256  ;;  %p1111_p12 = scmp.lt.s32.totalorder %s1413_s10, %s1109_s29 }
  0x6c   : > { %p1106_p3 = pnand %p1104_p10, %p1090_p9  ;;  %p1112_p1 = scmp.lt.s32.totalorder %s1110_s12, %s1103_s20 }
  0x6e   : > { %p1107_p7 = pneg %p1106_p3  ;;  %p1113_p2 = por %p1112_p1, %p1111_p12 }
  0x70   : > { %p1114_p4 = pnand %p1113_p2, %p1107_p7 }
  0x72   : > { %1117 = shalt.err (!%p1114_p4)
}
  0x73   : > { %951 = dma.hbm_to_vmem [thread:$0]  (!%p1409_p11), %s1407_s23, 128, %s1413_s10, %s270_s14  }
  0x74   : > { %p1565_p0 = scmp.ne.s32.totalorder %s1559_s9, 0 }
  0x75   : > { %s1443_s8 = sand.u32 (!%p1565_p0), 1, %s1184_s25   ;;  %p1566_p9 = scmp.ne.s32.totalorder (!%p1565_p0), %s1556_s30, 0 }
  0x76   : > { %289 = sbr.rel (%p1565_p0) target bundleno = 804 (0x324), region = 48  ;;  %s735_s17 = sshll.u32 (!%p1565_p0), %s1443_s8, 3 }
  0x77   : > { %s292_s21 = scalar_lea.sflag (!%p1565_p0), [#allocation3], %s1443_s8  ;;  %s1449_s16 = scalar_lea.vmem (!%p1565_p0), [#allocation2], %s735_s17 }
  0x7d   : > { %1163 = dma.done.wait (%p1566_p9), %s292_s21, 128  }
  0x7e   : > { %1165 = vsyncadd (%p1566_p9), %s292_s21, 4294967168  ;;  %p1567_p11 = scmp.eq.s32.totalorder %s1265_s28, 0 }
  0x80   : > { %1167 = dma.done.wait (%p1567_p11), [#allocation6], 2560   ;;  %p1568_p8 = pmov %p1567_p11 }
  0x82   : > { %1169 = vsyncadd (%p1568_p8), [#allocation6], 4294964736  ;;  %p1569_p13 = pmov %p1568_p8 }
  0x83   : > { %p1570_p6 = pmov %p1568_p8 }
  0x84   : > { %1171 = dma.done.wait (%p1569_p13), [#allocation9], 2048  }
  0x85   : > { %1173 = vsyncadd (%p1570_p6), [#allocation9], 4294965248  ;;  %v1200_v0 = vmov 0.0|0.0   ;;  %vm1201_vm0 = vmmov 0   ;;  %v1202_v1 = vmov 0.0   ;;  %v339_v2 = vld [vmem:[#allocation5] sm:$0xff] }
  0x86   : > { %868 = vmatprep.subr.bf16.mxu0 %v1200_v0  ;;  %795 = vmatprep.mubr.msk.f32.mxu0 %vm1201_vm0, %v1202_v1  ;;  %v340_v3 = vld [vmem:[#allocation5 + $0x8] sm:$0xff]  ;;  %v341_v4 = vld [vmem:[#allocation5 + $0x10] sm:$0xff]  ;;  %v342_v6 = vld [vmem:[#allocation5 + $0x18] sm:$0xff]  ;;  %vm350_vm1 = vcmask 261120   ;;  %s745_s13 = sshll.u32 %s1265_s28, 7  ;;  %s337_s20 = scalar_lea.vmem [#allocation10], %s735_s17 }
  0x87   : > { %874 = vmatprep.subr.bf16.mxu1 %v1200_v0  ;;  %830 = vmatprep.mubr.msk.f32.mxu1 %vm1201_vm0, %v1202_v1  ;;  %v869_v5 = vpack.c.bf16 %v340_v3, %v339_v2  ;;  %v425_v7 = vld [vmem:[#allocation7] sm:$0xff]  ;;  %v426_v8 = vld [vmem:[#allocation7 + $0x8] sm:$0xff]  ;;  %v427_v9 = vld [vmem:[#allocation7 + $0x10] sm:$0xff]  ;;  %v872_v11 = vpack.c.bf16 %v342_v6, %v341_v4  ;;  %s627_s15 = sshll.u32 %s337_s20, 4  ;;  %s1500_s21 = scalar_lea.hbm %s1551_s7, %s745_s13  ;;  %s1502_s15 = int_to_ptr.vmem [resolvable:$true] %s627_s15 }
  0x88   : > { %v428_v10 = vld [vmem:[#allocation7 + $0x18] sm:$0xff]  ;;  %v875_v12 = vpack.c.bf16 %v426_v8, %v425_v7  ;;  %v429_v14 = vld [vmem:[#allocation7 + $0x20] sm:$0xff]  ;;  %v430_v15 = vld [vmem:[#allocation7 + $0x28] sm:$0xff]  ;;  %s1118_s30 = scalar_lea.vmem %s1502_s15, 128  ;;  %s1203_s28 = smov [#allocation10]  }
  0x89   : > { %870 = vmatpush3.bf16.msra.mxu0 %v869_v5  ;;  %v878_v13 = vpack.c.bf16 %v428_v10, %v427_v9  ;;  %v338_v16 = vld [vmem:[%s1449_s16] sm:$0xff]  ;;  %v881_v17 = vpack.c.bf16 %v430_v15, %v429_v14  ;;  %v433_v21 = vld [vmem:[#allocation7 + $0x40] sm:$0xff]  ;;  %v434_v22 = vld [vmem:[#allocation7 + $0x48] sm:$0xff]  ;;  %s614_s16 = scalar_lea.sflag [#allocation4], %s1443_s8  ;;  %p1119_p10 = scmp.ne.s32.totalorder %s1502_s15, %s1118_s30 }
  0x8a   : > { %871 = vmatprep.subr.bf16.mxu0 %v1200_v0  ;;  %876 = vmatpush3.bf16.msra.mxu1 %v875_v12  ;;  %v431_v18 = vld [vmem:[#allocation7 + $0x30] sm:$0xff]  ;;  %v432_v19 = vld [vmem:[#allocation7 + $0x38] sm:$0xff]  ;;  %v887_v23 = vpack.c.bf16 %v434_v22, %v433_v21  ;;  %v437_v27 = vld [vmem:[#allocation7 + $0x60] sm:$0xff]  ;;  %s1122_s17 = sshll.u32 %s1203_s28, 4  ;;  %s1123_s17 = int_to_ptr.vmem [resolvable:$false] %s1122_s17 }
  0x8b   : > { %877 = vmatprep.subr.bf16.mxu1 %v1200_v0  ;;  %v884_v20 = vpack.c.bf16 %v432_v19, %v431_v18  ;;  %v435_v24 = vld [vmem:[#allocation7 + $0x50] sm:$0xff]  ;;  %v436_v25 = vld [vmem:[#allocation7 + $0x58] sm:$0xff]  ;;  %v438_v28 = vld [vmem:[#allocation7 + $0x68] sm:$0xff]  ;;  %p1120_p3 = pnand %p1119_p10, %p1398_p5  ;;  %s1124_s9 = scalar_lea.vmem %s1123_s17, 256 }
  0x8c   : > { %v890_v26 = vpack.c.bf16 %v436_v25, %v435_v24  ;;  %v893_v29 = vpack.c.bf16 %v438_v28, %v437_v27  ;;  %v439_v30 = vld [vmem:[#allocation7 + $0x70] sm:$0xff]  ;;  %v440_v31 = vld [vmem:[#allocation7 + $0x78] sm:$0xff]  ;;  %v519_v33 = vld [vmem:[#allocation8] sm:$0xff]  ;;  %p1125_p12 = scmp.lt.s32.totalorder %s1502_s15, %s1123_s17  ;;  %p1126_p1 = scmp.lt.s32.totalorder %s1124_s9, %s1118_s30 }
  0x8d   : > { %873 = vmatpush3.bf16.msra.mxu0 %v872_v11  ;;  %v896_v32 = vpack.c.bf16 %v440_v31, %v439_v30  ;;  %v520_v34 = vld [vmem:[#allocation8 + $0x8] sm:$0xff]  ;;  %v521_v35 = vld [vmem:[#allocation8 + $0x10] sm:$0xff]  ;;  %v522_v37 = vld [vmem:[#allocation8 + $0x18] sm:$0xff]  ;;  %p1121_p7 = pneg %p1120_p3 }
  0x8e   : > { %898 = vmatprep.subr.bf16.mxu0 %v1200_v0  ;;  %879 = vmatpush3.bf16.msra.mxu1 %v878_v13  ;;  %v899_v36 = vpack.c.bf16 %v520_v34, %v519_v33  ;;  %v902_v38 = vpack.c.bf16 %v522_v37, %v521_v35  ;;  %v523_v39 = vld [vmem:[#allocation8 + $0x20] sm:$0xff]  ;;  %v524_v40 = vld [vmem:[#allocation8 + $0x28] sm:$0xff]  ;;  %v525_v42 = vld [vmem:[#allocation8 + $0x30] sm:$0xff]  ;;  %p1127_p2 = por %p1126_p1, %p1125_p12 }
  0x8f   : > { %880 = vmatprep.subr.bf16.mxu1 %v1200_v0  ;;  %v905_v41 = vpack.c.bf16 %v524_v40, %v523_v39  ;;  %v526_v43 = vld [vmem:[#allocation8 + $0x38] sm:$0xff]  ;;  %v527_v45 = vld [vmem:[#allocation8 + $0x40] sm:$0xff]  ;;  %v528_v46 = vld [vmem:[#allocation8 + $0x48] sm:$0xff] }
  0x90   : > { %796 = vmatmul.mubr.msk.f32.vlgmr.msra.gmra.mrb[0].mxu0 %vm350_vm1, %v338_v16  ;;  %v908_v44 = vpack.c.bf16 %v526_v43, %v525_v42  ;;  %v911_v47 = vpack.c.bf16 %v528_v46, %v527_v45  ;;  %v529_v48 = vld [vmem:[#allocation8 + $0x50] sm:$0xff]  ;;  %v530_v49 = vld [vmem:[#allocation8 + $0x58] sm:$0xff]  ;;  %v531_v51 = vld [vmem:[#allocation8 + $0x60] sm:$0xff]  ;;  %p1128_p4 = pnand %p1127_p2, %p1121_p7 }
  0x91   : > { %865 = vmatprep.mubr.msk.f32.mxu0 %vm1201_vm0, %v1202_v1  ;;  %900 = vmatpush3.bf16.msra.mxu0 %v899_v36  ;;  %v914_v50 = vpack.c.bf16 %v530_v49, %v529_v48  ;;  %v532_v52 = vld [vmem:[#allocation8 + $0x68] sm:$0xff]  ;;  %v740_v54 = vld [vmem:[%s1546_s2] ss:$0 sm:$0xff]  ;;  %v534_v60 = vld [vmem:[#allocation8 + $0x78] sm:$0xff] }
  0x92   : > { %882 = vmatpush3.bf16.msra.mxu1 %v881_v17  ;;  %901 = vmatprep.subr.bf16.mxu0 %v1200_v0  ;;  %v917_v53 = vpack.c.bf16 %v532_v52, %v531_v51  ;;  %v533_v59 = vld [vmem:[#allocation8 + $0x70] sm:$0xff] }
  0x93   : > { %883 = vmatprep.subr.bf16.mxu1 %v1200_v0  ;;  %v920_v61 = vpack.c.bf16 %v534_v60, %v533_v59  ;;  %v742_v62 = vld [vmem:[%s1548_s4] ss:$0 sm:$0xff] }
  0x94   : > { %v743_v3 = vld [vmem:[%s1550_s6] ss:$0 sm:$0xff] }
  0x95   : > { %903 = vmatpush3.bf16.msra.mxu0 %v902_v38 }
  0x96   : > { %885 = vmatpush3.bf16.msra.mxu1 %v884_v20  ;;  %904 = vmatprep.subr.bf16.mxu0 %v1200_v0 }
  0x97   : > { %886 = vmatprep.subr.bf16.mxu1 %v1200_v0 }
  0x99   : > { %906 = vmatpush3.bf16.msra.mxu0 %v905_v41 }
  0x9a   : > { %888 = vmatpush3.bf16.msra.mxu1 %v887_v23  ;;  %907 = vmatprep.subr.bf16.mxu0 %v1200_v0 }
  0x9b   : > { %889 = vmatprep.subr.bf16.mxu1 %v1200_v0 }
  0x9d   : > { %909 = vmatpush3.bf16.msra.mxu0 %v908_v44 }
  0x9e   : > { %891 = vmatpush3.bf16.msra.mxu1 %v890_v26  ;;  %910 = vmatprep.subr.bf16.mxu0 %v1200_v0 }
  0x9f   : > { %892 = vmatprep.subr.bf16.mxu1 %v1200_v0 }
  0xa1   : > { %912 = vmatpush3.bf16.msra.mxu0 %v911_v47 }
  0xa2   : > { %894 = vmatpush3.bf16.msra.mxu1 %v893_v29  ;;  %913 = vmatprep.subr.bf16.mxu0 %v1200_v0 }
  0xa3   : > { %895 = vmatprep.subr.bf16.mxu1 %v1200_v0 }
  0xa5   : > { %915 = vmatpush3.bf16.msra.mxu0 %v914_v50 }
  0xa6   : > { %897 = vmatpush3.bf16.msra.mxu1 %v896_v32  ;;  %916 = vmatprep.subr.bf16.mxu0 %v1200_v0 }
  0xa9   : > { %918 = vmatpush3.bf16.msra.mxu0 %v917_v53 }
  0xaa   : > { %919 = vmatprep.subr.bf16.mxu0 %v1200_v0 }
  0xad   : > { %921 = vmatpush3.bf16.msra.mxu0 %v920_v61 }
 0x163   : > { %v420_v55 = vpop.f32.mrb[0].mxu0 }
 0x164   : > { %v421_v56 = vadd.f32 %v740_v54, %v420_v55  ;;  %v797_v57 = vpop.f32.mrb[1].mxu0 }
 0x166   : > { %v424_v58 = vmax.f32 %v421_v56, 0.0 }
 0x168   : > { %831 = vmatmul.mubr.f32.vlgmr.msra.gmra.mrb[0].mxu1 %v424_v58 }
 0x23b   : > { %v514_v63 = vpop.f32.mrb[0].mxu1 }
 0x23c   : > { %v515_v0 = vadd.f32 %v742_v62, %v514_v63  ;;  %v832_v1 = vpop.f32.mrb[1].mxu1 }
 0x23e   : > { %v518_v2 = vmax.f32 %v515_v0, 0.0 }
 0x240   : > { %866 = vmatmul.mubr.f32.vlgmr.msra.gmra.mrb[2].mxu0 %v518_v2 }
 0x313   : > { %v608_v4 = vpop.f32.mrb[2].mxu0 }
 0x314   : > { %v609_v5 = vadd.f32 %v743_v3, %v608_v4  ;;  %v867_v6 = vpop.f32.mrb[3].mxu0 }
 0x316   : > { %612 = vst [vmem:[%s337_s20] sm:$0xff] %v609_v5 }
 0x317   : > { %1131 = shalt.err (!%p1128_p4)
}
 0x318   : > { %s1132_s8 = scalar_lea.hbm %s1500_s21, 128  ;;  %s1136_s11 = scalar_lea.hbm %s1551_s7, 256 }
 0x319   : > { %p1133_p0 = scmp.ne.s32.totalorder %s1500_s21, %s1132_s8  ;;  %p1137_p8 = scmp.lt.u32.totalorder %s1500_s21, %s1551_s7 }
 0x31a   : > { %p1138_p13 = scmp.lt.u32.totalorder %s1136_s11, %s1132_s8  ;;  %p1140_p10 = scmp.lt.u32.totalorder %s1132_s8, %s1500_s21 }
 0x31b   : > { %p1134_p9 = pnand %p1133_p0, %p1398_p5 }
 0x31c   : > { %p1139_p6 = por %p1138_p13, %p1137_p8 }
 0x31d   : > { %p1135_p11 = pneg %p1134_p9 }
 0x31e   : > { %p1141_p3 = por %p1140_p10, %p1139_p6 }
 0x320   : > { %p1142_p7 = pnand %p1141_p3, %p1135_p11 }
 0x322   : > { %1145 = shalt.err (!%p1142_p7)
}
 0x323   : > { %936 = dma.vmem_to_hbm [thread:$0]  (%p1398_p5), %s1502_s15, 128, %s1500_s21, %s614_s16  }
 0x324 PF: > { %s1571_s20 = sld [smem:[#allocation15_spill]]  ;;  %s639_s29 = sand.u32 1, %s1180_s24  }
 0x325   : > { %p1573_p1 = scmp.ge.s32.totalorder %s1192_s27, 2  ;;  %s640_s12 = scalar_lea.sflag [#allocation4], %s639_s29 }
 0x32a   : > { %p1572_p12 = scmp.ne.s32.totalorder %s1571_s20, 0 }
 0x32c   : > { %p953_p2 = pnand %p1573_p1, %p1572_p12 }
 0x32e   : > { %1175 = dma.done.wait (!%p953_p2), %s640_s12, 128  }
 0x32f   : > { %1177 = vsyncadd (!%p953_p2), %s640_s12, 4294967168  ;;  %p22_p4 = scmp.ge.s32.totalorder %s1384_s22, 4   ;;  %s1574_s24 = smov %s1184_s25 }
 0x330   : > { %s1575_s25 = smov %s1188_s26  ;;  %s1576_s26 = smov %s1394_s18 }
 0x331   : > { %s1577_s27 = smov %s1384_s22  ;;  %24 = sbr.rel (!%p22_p4) target bundleno = 7 (0x7), region = 105 }
 0x338   :  { %645 = vsyncpa [#allocation3], 1 }
 0x339   :  { %647 = vsyncpa [#allocation3 + $0x1], 1 }
 0x33a   :  { %648 = vsyncpa [#allocation6], 1 }
 0x33b   :  { %649 = vsyncpa [#allocation9], 1 }
 0x33c   :  { %650 = vsyncpa [#allocation4], 1 }
 0x33d   :  { %652 = vsyncpa [#allocation4 + $0x1], 1 }

</bundles_post_ra>
